<compile_context>
chip_gen: v5e
topology: v5e:2x2
jax: 0.10.0
libtpu: 0.0.40
codegen_flags: <defaults>
</compile_context>

<pallas_src>
import jax
import jax.numpy as jnp
from jax.experimental import pallas as pl
from jax.experimental.pallas import tpu as pltpu

LANES = 128
MAX_TILE_ROWS = 2048          # 2048 x 128 f32 = 1 MiB per input block
MAX_PARALLEL_SLICES = 2       # lets v7x's two TensorCores split the reduction


def _round_up(x, m):
    return ((x + m - 1) // m) * m


def _sublane_align(*dtypes):
    """Minimum row (sublane) multiple required by the narrowest input dtype."""
    align = 8
    for dt in dtypes:
        align = max(align, 8 * max(1, 4 // jnp.dtype(dt).itemsize))
    return align


def _dice_bce_kernel(x_ref, t_ref, out_ref, inter_acc, denom_acc, bce_acc):
    i = pl.program_id(1)          # inner ("arbitrary") reduction axis

    @pl.when(i == 0)
    def _init():
        inter_acc[...] = jnp.zeros_like(inter_acc)
        denom_acc[...] = jnp.zeros_like(denom_acc)
        bce_acc[...] = jnp.zeros_like(bce_acc)

    # Cast the loaded tile in-kernel (inputs stay in their original dtype in
    # HBM -> halves HBM bytes for bf16 inputs on mem-bound v5e/v6e).
    x = x_ref[...].astype(jnp.float32)
    t = t_ref[...].astype(jnp.float32)

    rows = x.shape[0]
    shp = (rows // 8, 8, LANES)   # sublane-preserving grouping; no XLU needed

    # vreg-sized accumulation: reduce each per-step contribution to (8, 128)
    # with a tree of VALU adds, then a single small accumulator update.
    inter_acc[...] += jnp.sum((x * t).reshape(shp), axis=0)
    denom_acc[...] += jnp.sum((x + t).reshape(shp), axis=0)

    # torch.nn.functional.binary_cross_entropy clamps each log term at -100.
    # That clamp also makes zero-padded elements (x=0, t=0) contribute exactly
    # 0 here, so no padding mask is required.
    log_x = jnp.maximum(jnp.log(x), -100.0)
    log_1mx = jnp.maximum(jnp.log1p(-x), -100.0)
    # t*log_x + (1-t)*log_1mx == log_1mx + t*(log_x - log_1mx)  (fewer VALU ops)
    bce_acc[...] -= jnp.sum((log_1mx + t * (log_x - log_1mx)).reshape(shp),
                            axis=0)

    @pl.when(i == pl.num_programs(1) - 1)
    def _finish():
        inter_s = jnp.sum(inter_acc[...])
        denom_s = jnp.sum(denom_acc[...])
        bce_s = jnp.sum(bce_acc[...])
        # Pack the three per-slice partial sums into rows 0..2 of the (8, 128)
        # output block with one lane-dense full-tile store.
        row = jax.lax.broadcasted_iota(jnp.int32, out_ref.shape, 0)
        out_ref[...] = jnp.where(
            row == 0, inter_s,
            jnp.where(row == 1, denom_s,
                      jnp.where(row == 2, bce_s, 0.0)))


def dice_bce_loss(inputs, targets, smooth=1.0):
    x = inputs.reshape(-1)
    t = targets.reshape(-1)
    n = x.shape[0]

    row_align = _sublane_align(x.dtype, t.dtype)
    align_elems = row_align * LANES

    # Pad only when the flat length is not already lane/sublane aligned; the
    # pad is at most one (row_align, 128) tile and contributes exactly 0 to
    # every accumulated term (see the -100 clamp note in the kernel).
    n_pad = _round_up(n, align_elems)
    if n_pad != n:
        x = jnp.pad(x, (0, n_pad - n))
        t = jnp.pad(t, (0, n_pad - n))

    total_rows = n_pad // LANES

    # Largest aligned tile that exactly divides the data (never force a
    # whole-array pad just to round the tiling).
    cap = min(MAX_TILE_ROWS, total_rows)
    tile_rows = row_align
    for cand in range(cap - cap % row_align, row_align - 1, -row_align):
        if total_rows % cand == 0:
            tile_rows = cand
            break

    num_blocks = total_rows // tile_rows
    num_slices = (MAX_PARALLEL_SLICES
                  if (num_blocks > 1 and num_blocks % MAX_PARALLEL_SLICES == 0)
                  else 1)
    steps = num_blocks // num_slices

    x2 = x.reshape(total_rows, LANES)
    t2 = t.reshape(total_rows, LANES)

    def _build(dim_sem):
        return pl.pallas_call(
            _dice_bce_kernel,
            out_shape=jax.ShapeDtypeStruct((num_slices * 8, LANES),
                                           jnp.float32),
            grid_spec=pltpu.PrefetchScalarGridSpec(
                num_scalar_prefetch=0,
                grid=(num_slices, steps),
                in_specs=[
                    pl.BlockSpec((tile_rows, LANES),
                                 lambda s, i: (s * steps + i, 0)),
                    pl.BlockSpec((tile_rows, LANES),
                                 lambda s, i: (s * steps + i, 0)),
                ],
                out_specs=pl.BlockSpec((8, LANES), lambda s, i: (s, 0)),
                scratch_shapes=[pltpu.VMEM((8, LANES), jnp.float32)
                                for _ in range(3)],
            ),
            compiler_params=pltpu.CompilerParams(
                dimension_semantics=dim_sem),
        )

    if num_slices > 1:
        # True cross-TensorCore sharding on multi-TC chips (v7x); fall back to
        # plain "parallel" on single-TC generations (v5e/v6e).
        candidates = [(pltpu.CORE_PARALLEL, pltpu.ARBITRARY),
                      ("parallel", "arbitrary")]
    else:
        candidates = [("arbitrary", "arbitrary")]

    partials = None
    err = None
    for dim_sem in candidates:
        try:
            partials = _build(dim_sem)(x2, t2)
            break
        except Exception as e:   # single-TC chip rejecting CORE_PARALLEL
            err = e
    if partials is None:
        raise err

    # Tiny scalar epilogue: combine per-slice partial sums into the loss.
    parts = partials.reshape(num_slices, 8, LANES)[:, :3, 0]   # (slices, 3)
    sums = parts.sum(axis=0)
    inter, denom, bce_sum = sums[0], sums[1], sums[2]
    dice_loss = 1.0 - (2.0 * inter + smooth) / (denom + smooth)
    bce_mean = bce_sum / jnp.float32(n)
    return bce_mean + dice_loss


def _reference(inputs, targets, smooth=1.0):
    x = inputs.reshape(-1).astype(jnp.float32)
    t = targets.reshape(-1).astype(jnp.float32)
    inter = jnp.sum(x * t)
    dice = 1.0 - (2.0 * inter + smooth) / (jnp.sum(x) + jnp.sum(t) + smooth)
    log_x = jnp.maximum(jnp.log(x), -100.0)
    log_1mx = jnp.maximum(jnp.log1p(-x), -100.0)
    bce = jnp.mean(-(t * log_x + (1.0 - t) * log_1mx))
    return bce + dice


if __name__ == "__main__":
    key = jax.random.PRNGKey(0)
    k1, k2 = jax.random.split(key)

    # NCHW, like the PyTorch module's typical segmentation inputs.
    shape = (2, 4, 16, 16)
    inputs = jax.nn.sigmoid(jax.random.normal(k1, shape, dtype=jnp.float32))
    targets = (jax.random.uniform(k2, shape) > 0.5).astype(jnp.float32)

    loss = dice_bce_loss(inputs, targets, smooth=1.0)
    jax.block_until_ready(loss)

    ref = _reference(inputs, targets, smooth=1.0)
    assert jnp.allclose(loss, ref, rtol=1e-5, atol=1e-5), (loss, ref)

    print("KERNEL_OK")
</pallas_src>

<mosaic_0001>
module attributes {stable_mosaic.version = 11 : i64} {
  func.func @_dice_bce_kernel(%arg0: i32, %arg1: i32, %arg2: memref<16x128xf32, #tpu.memory_space<vmem>>, %arg3: memref<16x128xf32, #tpu.memory_space<vmem>>, %arg4: memref<8x128xf32, #tpu.memory_space<vmem>>, %arg5: memref<8x128xf32, #tpu.memory_space<vmem>>, %arg6: memref<8x128xf32, #tpu.memory_space<vmem>>, %arg7: memref<8x128xf32, #tpu.memory_space<vmem>>) attributes {dimension_semantics = [#tpu.dimension_semantics<arbitrary>, #tpu.dimension_semantics<arbitrary>], iteration_bounds = array<i64: 1, 1>, scalar_prefetch = 0 : i64, scratch_operands = 3 : i64, tpu.core_type = #tpu.core_type<tc>, window_params = [{transform_indices = @transform_0, window_bounds = array<i64: 16, 128>}, {transform_indices = @transform_1, window_bounds = array<i64: 16, 128>}, {transform_indices = @transform_2, window_bounds = array<i64: 8, 128>}]} {
    %c0_i32 = arith.constant 0 : i32
    %0 = arith.cmpi eq, %arg1, %c0_i32 : i32
    %1 = arith.extui %0 : i1 to i32
    %c0_i32_0 = arith.constant 0 : i32
    %2 = arith.cmpi ne, %1, %c0_i32_0 : i32
    scf.if %2 {
      %cst_23 = arith.constant 0.000000e+00 : f32
      %36 = vector.broadcast %cst_23 : f32 to vector<8x128xf32>
      %c0_24 = arith.constant 0 : index
      %c0_25 = arith.constant 0 : index
      %37 = vector.load %arg5[%c0_24, %c0_25] : memref<8x128xf32, #tpu.memory_space<vmem>>, vector<8x128xf32>
      tpu.vector_store %arg5[%c0_24, %c0_25], %36 {strides = array<i32>} : memref<8x128xf32, #tpu.memory_space<vmem>>, vector<8x128xf32>,
      %cst_26 = arith.constant 0.000000e+00 : f32
      %38 = vector.broadcast %cst_26 : f32 to vector<8x128xf32>
      %c0_27 = arith.constant 0 : index
      %c0_28 = arith.constant 0 : index
      %39 = vector.load %arg6[%c0_27, %c0_28] : memref<8x128xf32, #tpu.memory_space<vmem>>, vector<8x128xf32>
      tpu.vector_store %arg6[%c0_27, %c0_28], %38 {strides = array<i32>} : memref<8x128xf32, #tpu.memory_space<vmem>>, vector<8x128xf32>,
      %cst_29 = arith.constant 0.000000e+00 : f32
      %40 = vector.broadcast %cst_29 : f32 to vector<8x128xf32>
      %c0_30 = arith.constant 0 : index
      %c0_31 = arith.constant 0 : index
      %41 = vector.load %arg7[%c0_30, %c0_31] : memref<8x128xf32, #tpu.memory_space<vmem>>, vector<8x128xf32>
      tpu.vector_store %arg7[%c0_30, %c0_31], %40 {strides = array<i32>} : memref<8x128xf32, #tpu.memory_space<vmem>>, vector<8x128xf32>,
    } else {
    }
    %c0 = arith.constant 0 : index
    %c0_1 = arith.constant 0 : index
    %3 = vector.load %arg2[%c0, %c0_1] : memref<16x128xf32, #tpu.memory_space<vmem>>, vector<16x128xf32>
    %c0_2 = arith.constant 0 : index
    %c0_3 = arith.constant 0 : index
    %4 = vector.load %arg3[%c0_2, %c0_3] : memref<16x128xf32, #tpu.memory_space<vmem>>, vector<16x128xf32>
    %c0_4 = arith.constant 0 : index
    %c0_5 = arith.constant 0 : index
    %5 = vector.load %arg5[%c0_4, %c0_5] : memref<8x128xf32, #tpu.memory_space<vmem>>, vector<8x128xf32>
    %6 = arith.mulf %3, %4 : vector<16x128xf32>
    %7 = vector.shape_cast %6 : vector<16x128xf32> to vector<2x8x128xf32>
    %cst = arith.constant dense<0.000000e+00> : vector<8x128xf32>
    %8 = vector.multi_reduction <add>, %7, %cst [0] : vector<2x8x128xf32> to vector<8x128xf32>
    %9 = arith.addf %5, %8 : vector<8x128xf32>
    %c0_6 = arith.constant 0 : index
    %c0_7 = arith.constant 0 : index
    %10 = vector.load %arg5[%c0_6, %c0_7] : memref<8x128xf32, #tpu.memory_space<vmem>>, vector<8x128xf32>
    tpu.vector_store %arg5[%c0_6, %c0_7], %9 {strides = array<i32>} : memref<8x128xf32, #tpu.memory_space<vmem>>, vector<8x128xf32>,
    %c0_8 = arith.constant 0 : index
    %c0_9 = arith.constant 0 : index
    %11 = vector.load %arg6[%c0_8, %c0_9] : memref<8x128xf32, #tpu.memory_space<vmem>>, vector<8x128xf32>
    %12 = arith.addf %3, %4 : vector<16x128xf32>
    %13 = vector.shape_cast %12 : vector<16x128xf32> to vector<2x8x128xf32>
    %cst_10 = arith.constant dense<0.000000e+00> : vector<8x128xf32>
    %14 = vector.multi_reduction <add>, %13, %cst_10 [0] : vector<2x8x128xf32> to vector<8x128xf32>
    %15 = arith.addf %11, %14 : vector<8x128xf32>
    %c0_11 = arith.constant 0 : index
    %c0_12 = arith.constant 0 : index
    %16 = vector.load %arg6[%c0_11, %c0_12] : memref<8x128xf32, #tpu.memory_space<vmem>>, vector<8x128xf32>
    tpu.vector_store %arg6[%c0_11, %c0_12], %15 {strides = array<i32>} : memref<8x128xf32, #tpu.memory_space<vmem>>, vector<8x128xf32>,
    %17 = math.log %3 : vector<16x128xf32>
    %cst_13 = arith.constant -1.000000e+02 : f32
    %18 = vector.broadcast %cst_13 : f32 to vector<16x128xf32>
    %19 = arith.maximumf %17, %18 : vector<16x128xf32>
    %cst_14 = arith.constant 0.000000e+00 : f32
    %20 = vector.broadcast %cst_14 : f32 to vector<16x128xf32>
    %21 = arith.subf %20, %3 : vector<16x128xf32>
    %22 = math.log1p %21 : vector<16x128xf32>
    %cst_15 = arith.constant -1.000000e+02 : f32
    %23 = vector.broadcast %cst_15 : f32 to vector<16x128xf32>
    %24 = arith.maximumf %22, %23 : vector<16x128xf32>
    %c0_16 = arith.constant 0 : index
    %c0_17 = arith.constant 0 : index
    %25 = vector.load %arg7[%c0_16, %c0_17] : memref<8x128xf32, #tpu.memory_space<vmem>>, vector<8x128xf32>
    %26 = arith.subf %19, %24 : vector<16x128xf32>
    %27 = arith.mulf %4, %26 : vector<16x128xf32>
    %28 = arith.addf %24, %27 : vector<16x128xf32>
    %29 = vector.shape_cast %28 : vector<16x128xf32> to vector<2x8x128xf32>
    %cst_18 = arith.constant dense<0.000000e+00> : vector<8x128xf32>
    %30 = vector.multi_reduction <add>, %29, %cst_18 [0] : vector<2x8x128xf32> to vector<8x128xf32>
    %31 = arith.subf %25, %30 : vector<8x128xf32>
    %c0_19 = arith.constant 0 : index
    %c0_20 = arith.constant 0 : index
    %32 = vector.load %arg7[%c0_19, %c0_20] : memref<8x128xf32, #tpu.memory_space<vmem>>, vector<8x128xf32>
    tpu.vector_store %arg7[%c0_19, %c0_20], %31 {strides = array<i32>} : memref<8x128xf32, #tpu.memory_space<vmem>>, vector<8x128xf32>,
    %c0_i32_21 = arith.constant 0 : i32
    %33 = arith.cmpi eq, %arg1, %c0_i32_21 : i32
    %34 = arith.extui %33 : i1 to i32
    %c0_i32_22 = arith.constant 0 : i32
    %35 = arith.cmpi ne, %34, %c0_i32_22 : i32
    scf.if %35 {
      %c0_23 = arith.constant 0 : index
      %c0_24 = arith.constant 0 : index
      %36 = vector.load %arg5[%c0_23, %c0_24] : memref<8x128xf32, #tpu.memory_space<vmem>>, vector<8x128xf32>
      %37 = vector.shape_cast %36 : vector<8x128xf32> to vector<1x8x128xf32>
      %cst_25 = arith.constant dense<0.000000e+00> : vector<1xf32>
      %38 = vector.multi_reduction <add>, %37, %cst_25 [1, 2] : vector<1x8x128xf32> to vector<1xf32>
      %39 = vector.shape_cast %38 : vector<1xf32> to vector<1x1x1xf32>
      %40 = vector.extract %39[0, 0, 0] : f32 from vector<1x1x1xf32>
      %c0_26 = arith.constant 0 : index
      %c0_27 = arith.constant 0 : index
      %41 = vector.load %arg6[%c0_26, %c0_27] : memref<8x128xf32, #tpu.memory_space<vmem>>, vector<8x128xf32>
      %42 = vector.shape_cast %41 : vector<8x128xf32> to vector<1x8x128xf32>
      %cst_28 = arith.constant dense<0.000000e+00> : vector<1xf32>
      %43 = vector.multi_reduction <add>, %42, %cst_28 [1, 2] : vector<1x8x128xf32> to vector<1xf32>
      %44 = vector.shape_cast %43 : vector<1xf32> to vector<1x1x1xf32>
      %45 = vector.extract %44[0, 0, 0] : f32 from vector<1x1x1xf32>
      %c0_29 = arith.constant 0 : index
      %c0_30 = arith.constant 0 : index
      %46 = vector.load %arg7[%c0_29, %c0_30] : memref<8x128xf32, #tpu.memory_space<vmem>>, vector<8x128xf32>
      %47 = vector.shape_cast %46 : vector<8x128xf32> to vector<1x8x128xf32>
      %cst_31 = arith.constant dense<0.000000e+00> : vector<1xf32>
      %48 = vector.multi_reduction <add>, %47, %cst_31 [1, 2] : vector<1x8x128xf32> to vector<1xf32>
      %49 = vector.shape_cast %48 : vector<1xf32> to vector<1x1x1xf32>
      %50 = vector.extract %49[0, 0, 0] : f32 from vector<1x1x1xf32>
      %51 = tpu.iota {dimensions = array<i32: 0>} : vector<8x128xi32>
      %c0_i32_32 = arith.constant 0 : i32
      %52 = vector.broadcast %c0_i32_32 : i32 to vector<8x128xi32>
      %53 = arith.cmpi eq, %51, %52 : vector<8x128xi32>
      %c1_i32 = arith.constant 1 : i32
      %54 = vector.broadcast %c1_i32 : i32 to vector<8x128xi32>
      %55 = arith.cmpi eq, %51, %54 : vector<8x128xi32>
      %c2_i32 = arith.constant 2 : i32
      %56 = vector.broadcast %c2_i32 : i32 to vector<8x128xi32>
      %57 = arith.cmpi eq, %51, %56 : vector<8x128xi32>
      %cst_33 = arith.constant 0.000000e+00 : f32
      %58 = vector.broadcast %50 : f32 to vector<8x128xf32>
      %59 = vector.broadcast %cst_33 : f32 to vector<8x128xf32>
      %60 = arith.select %57, %58, %59 : vector<8x128xi1>, vector<8x128xf32>
      %61 = vector.broadcast %45 : f32 to vector<8x128xf32>
      %62 = arith.select %55, %61, %60 : vector<8x128xi1>, vector<8x128xf32>
      %63 = vector.broadcast %40 : f32 to vector<8x128xf32>
      %64 = arith.select %53, %63, %62 : vector<8x128xi1>, vector<8x128xf32>
      %c0_34 = arith.constant 0 : index
      %c0_35 = arith.constant 0 : index
      %65 = vector.load %arg4[%c0_34, %c0_35] : memref<8x128xf32, #tpu.memory_space<vmem>>, vector<8x128xf32>
      tpu.vector_store %arg4[%c0_34, %c0_35], %64 {strides = array<i32>} : memref<8x128xf32, #tpu.memory_space<vmem>>, vector<8x128xf32>,
    } else {
    }
    return
  }
  func.func @transform_0(%arg0: i32, %arg1: i32) -> (i32, i32) {
    %c1_i32 = arith.constant 1 : i32
    %0 = arith.muli %arg0, %c1_i32 : i32
    %1 = arith.addi %0, %arg1 : i32
    %c0_i32 = arith.constant 0 : i32
    %c0_i32_0 = arith.constant 0 : i32
    return %1, %c0_i32 : i32, i32
  }
  func.func @transform_1(%arg0: i32, %arg1: i32) -> (i32, i32) {
    %c1_i32 = arith.constant 1 : i32
    %0 = arith.muli %arg0, %c1_i32 : i32
    %1 = arith.addi %0, %arg1 : i32
    %c0_i32 = arith.constant 0 : i32
    %c0_i32_0 = arith.constant 0 : i32
    return %1, %c0_i32 : i32, i32
  }
  func.func @transform_2(%arg0: i32, %arg1: i32) -> (i32, i32) {
    %c0_i32 = arith.constant 0 : i32
    %c0_i32_0 = arith.constant 0 : i32
    return %arg0, %c0_i32 : i32, i32
  }
}

</mosaic_0001>

<bundles_post_ra>
// kernel: tpu_custom_call.1
= control target key start
LH: loop header
LB: loop body
LE: loop exit
PB: predicated region body
PF: predicated region fallthrough
CT: control target
= control target key end

     0   :  { %7 = vsyncpa [#allocation6], 0  ;;  %s306_s0 = inlined_call_operand.hbm [shape: f32[16,128], index: 0, kind: input, shape index: {}]   ;;  %s307_s1 = inlined_call_operand.hbm [shape: f32[16,128], index: 1, kind: input, shape index: {}]   ;;  %s308_s2 = inlined_call_operand.hbm [shape: f32[8,128], index: 2, kind: output, shape index: {}]  }
   0x1   :  { %8 = vsyncpa [#allocation9], 0 }
   0x2   :  { %9 = vsyncpa [#allocation7], 0  ;;  %s18_s11 = sshll.u32 %s306_s0, 4  ;;  %s277_s12 = smov [#allocation5]   ;;  %s19_s11 = int_to_ptr.hbm [resolvable:$true] %s18_s11 }
   0x3   :  { %s20_s13 = sshll.u32 %s277_s12, 4  ;;  %s35_s16 = sshll.u32 %s307_s1, 4  ;;  %s21_s13 = int_to_ptr.vmem [resolvable:$true] %s20_s13  ;;  %s36_s16 = int_to_ptr.hbm [resolvable:$true] %s35_s16 }
   0x4   :  { %s278_s17 = smov 128   ;;  %s279_s18 = smov 8  }
   0x5   :  { %26 = dma.hbm_to_vmem [thread:$0]  %s19_s11, 256, %s21_s13, [#allocation6], %s278_s17, %s278_s17, %s279_s18  }
   0x6   :  { %s280_s19 = smov [#allocation8]  }
   0x7   :  { %s37_s20 = sshll.u32 %s280_s19, 4  ;;  %s38_s20 = int_to_ptr.vmem [resolvable:$true] %s37_s20 }
   0x8   :  { %43 = dma.hbm_to_vmem [thread:$0]  %s36_s16, 256, %s38_s20, [#allocation9], %s278_s17, %s278_s17, %s279_s18  }
   0x9   :  { %271 = dma.done.wait [#allocation6], 256  }
   0xa   :  { %272 = vsyncadd [#allocation6], 4294967040 }
   0xb   :  { %273 = dma.done.wait [#allocation9], 256  }
   0xc   :  { %274 = vsyncadd [#allocation9], 4294967040  ;;  %v63_v0 = vld [vmem:[#allocation5] sm:$0xff]  ;;  %v64_v1 = vld [vmem:[#allocation5 + $0x8] sm:$0xff]  ;;  %s281_s21 = smov [#allocation10]   ;;  %s169_s26 = sshll.u32 %s308_s2, 4  ;;  %s170_s26 = int_to_ptr.hbm [resolvable:$true] %s169_s26 }
   0xd   :  { %v65_v2 = vld [vmem:[#allocation8] sm:$0xff]  ;;  %v66_v3 = vld [vmem:[#allocation8 + $0x8] sm:$0xff]  ;;  %191 = vlog2.f32 %v63_v0  ;;  %v85_v5 = vsub.f32 0.0, %v63_v0  ;;  %v86_v6 = vsub.f32 0.0, %v64_v1  ;;  %s167_s22 = sshll.u32 %s281_s21, 4  ;;  %s168_s22 = int_to_ptr.vmem [resolvable:$true] %s167_s22 }
   0xe   :  { %v68_v4 = vmul.f32 %v65_v2, %v63_v0  ;;  %v69_v7 = vmul.f32 %v66_v3, %v64_v1  ;;  %193 = vlog2.f32 %v64_v1  ;;  %v74_v13 = vadd.f32 %v65_v2, %v63_v0 }
   0xf   :  { %v87_v8 = vadd.f32 1.0, %v85_v5  ;;  %v90_v9 = vmul.f32 -0.5, %v85_v5  ;;  %v96_v10 = vadd.f32 1.0, %v86_v6  ;;  %v99_v12 = vmul.f32 -0.5, %v86_v6 }
  0x10   :  { %v70_v11 = vadd.f32 %v69_v7, %v68_v4  ;;  %v75_v14 = vadd.f32 %v66_v3, %v64_v1  ;;  %v93_v17 = vand.u32 2147483647, %v85_v5  ;;  %v102_v20 = vand.u32 2147483647, %v86_v6 }
  0x11   :  { %195 = vlog2.f32 %v87_v8  ;;  %v91_v15 = vadd.f32 1.0, %v90_v9  ;;  %v100_v18 = vadd.f32 1.0, %v99_v12  ;;  %v150_v1 = vlaneseq }
  0x12   :  { %121 = vadd.xlane.f32.xlu0 %v70_v11  ;;  %197 = vlog2.f32 %v96_v10  ;;  %v76_v22 = vadd.f32 %v75_v14, %v74_v13  ;;  %vm94_vm0 = vcmp.lt.f32.partialorder %v93_v17, 0.0004427343  ;;  %vm103_vm1 = vcmp.lt.f32.partialorder %v102_v20, 0.0004427343 }
  0x13   :  { %v192_v16 = vpop.eup %191  ;;  %v92_v24 = vmul.f32 %v91_v15, %v85_v5  ;;  %v101_v26 = vmul.f32 %v100_v18, %v86_v6 }
  0x14   :  { %v194_v19 = vpop.eup %193  ;;  %v80_v21 = vmul.f32 0.6931472, %v192_v16 }
  0x15   :  { %v82_v23 = vmul.f32 0.6931472, %v194_v19 }
  0x16   :  { %v83_v29 = vmax.f32 %v80_v21, -100.0 }
  0x17   :  { %v196_v25 = vpop.eup %195  ;;  %v84_v31 = vmax.f32 %v82_v23, -100.0 }
  0x18   :  { %v198_v27 = vpop.eup %197  ;;  %v89_v28 = vmul.f32 0.6931472, %v196_v25 }
  0x19   :  { %v98_v30 = vmul.f32 0.6931472, %v198_v27 }
  0x1a   :  { %131 = vadd.xlane.f32.xlu0 %v76_v22  ;;  %v95_v32 = vsel %vm94_vm0, %v92_v24, %v89_v28 }
  0x1b   :  { %v104_v33 = vsel %vm103_vm1, %v101_v26, %v98_v30  ;;  %v105_v34 = vmax.f32 %v95_v32, -100.0 }
  0x1c   :  { %v106_v35 = vmax.f32 %v104_v33, -100.0 }
  0x1d   :  { %v108_v36 = vsub.f32 %v83_v29, %v105_v34 }
  0x1e   :  { %v109_v37 = vsub.f32 %v84_v31, %v106_v35 }
  0x1f   :  { %v110_v38 = vmul.f32 %v108_v36, %v65_v2  ;;  %v151_v2 = vshrl.u32 %v150_v1, 7 }
  0x20   :  { %v111_v39 = vmul.f32 %v109_v37, %v66_v3 }
  0x21   :  { %v112_v40 = vadd.f32 %v110_v38, %v105_v34  ;;  %vm154_vm2 = vcmp.eq.s32.totalorder %v151_v2, 2  ;;  %vm153_vm3 = vcmp.eq.s32.totalorder %v151_v2, 1  ;;  %vm152_vm4 = vcmp.eq.s32.totalorder %v151_v2, 0 }
  0x22   :  { %v113_v41 = vadd.f32 %v111_v39, %v106_v35 }
  0x24   :  { %v114_v42 = vadd.f32 %v113_v41, %v112_v40 }
  0x26   :  { %v115_v43 = vsub.f32 0.0, %v114_v42 }
  0x28   :  { %141 = vadd.xlane.f32.xlu1 %v115_v43 }
  0x85   :  { %v122_v44 = vpop.xlane.xlu0 %121 }
  0x86   :  { %v123_v45 = vrot.slane %v122_v44, 4 }
  0x88   :  { %v124_v46 = vadd.f32 %v123_v45, %v122_v44 }
  0x8a   :  { %v125_v47 = vrot.slane %v124_v46, 2 }
  0x8c   :  { %v126_v48 = vadd.f32 %v125_v47, %v124_v46 }
  0x8d   :  { %v132_v49 = vpop.xlane.xlu0 %131 }
  0x8e   :  { %v133_v50 = vrot.slane %v132_v49, 4  ;;  %v127_v51 = vrot.slane %v126_v48, 1 }
  0x90   :  { %v134_v52 = vadd.f32 %v133_v50, %v132_v49  ;;  %v128_v53 = vadd.f32 %v127_v51, %v126_v48 }
  0x92   :  { %v135_v54 = vrot.slane %v134_v52, 2  ;;  %180 = vpush %v128_v53 }
  0x94   :  { %v136_v55 = vadd.f32 %v135_v54, %v134_v52 }
  0x96   :  { %v137_v56 = vrot.slane %v136_v55, 1 }
  0x98   :  { %v138_v57 = vadd.f32 %v137_v56, %v136_v55 }
  0x9a   :  { %182 = vpush %v138_v57 }
  0x9b   :  { %v142_v58 = vpop.xlane.xlu1 %141 }
  0x9c   :  { %v143_v59 = vrot.slane %v142_v58, 4 }
  0x9e   :  { %v144_v60 = vadd.f32 %v143_v59, %v142_v58 }
  0xa0   :  { %v145_v61 = vrot.slane %v144_v60, 2 }
  0xa2   :  { %v146_v62 = vadd.f32 %v145_v61, %v144_v60 }
  0xa4   :  { %v147_v63 = vrot.slane %v146_v62, 1 }
  0xa6   :  { %v148_v0 = vadd.f32 %v147_v63, %v146_v62 }
  0xa8   :  { %184 = vpush %v148_v0 }
  0xc3   :  { %s181_s0 = spop %180 }
  0xc4   :  { %v159_v6 = vstv %s181_s0 }
  0xcb   :  { %s183_s1 = spop %182 }
  0xcc   :  { %v157_v4 = vstv %s183_s1 }
  0xd9   :  { %s185_s23 = spop %184 }
  0xda   :  { %v155_v3 = vstv %s185_s23 }
  0xdb   :  { %v156_v5 = vsel %vm154_vm2, %v155_v3, 0.0 }
  0xdc   :  { %v158_v7 = vsel %vm153_vm3, %v157_v4, %v156_v5 }
  0xdd   :  { %v160_v8 = vsel %vm152_vm4, %v159_v6, %v158_v7 }
  0xde   :  { %161 = vst [vmem:[#allocation10] sm:$0xff] %v160_v8 }
  0xdf   :  { %172 = dma.vmem_to_hbm [thread:$0]  %s168_s22, 128, %s170_s26, [#allocation7]  }
  0xe0   :  { %275 = dma.done.wait [#allocation7], 128  }
  0xe1   :  { %276 = vsyncadd [#allocation7], 4294967168 }
  0xe2   :  { %177 = vsyncpa [#allocation6], 1 }
  0xe3   :  { %178 = vsyncpa [#allocation9], 1 }
  0xe4   :  { %179 = vsyncpa [#allocation7], 1 }

</bundles_post_ra>
